<compile_context>
chip_gen: v5e
topology: v5e:2x2
jax: 0.10.0
libtpu: 0.0.40
codegen_flags: <defaults>
</compile_context>

<pallas_src>
import jax
import jax.numpy as jnp
from jax.experimental import pallas as pl
from jax.experimental.pallas import tpu as pltpu


def _frozen_bn_kernel(x_ref, scale_ref, shift_ref, o_ref):
    # x_ref/o_ref: (tile_r, tile_l);  scale_ref/shift_ref: (1, tile_l) f32.
    x = x_ref[...].astype(jnp.float32)
    # (1, tile_l) against (tile_r, tile_l): sublane broadcast -- cheap on the VPU.
    o_ref[...] = (x * scale_ref[...] + shift_ref[...]).astype(o_ref.dtype)


def _vmem_capacity_bytes():
    try:
        cap = getattr(pltpu.get_tpu_info(), "vmem_capacity_bytes", None)
        if cap:
            return int(cap)
    except Exception:
        pass
    return 64 << 20   # conservative fallback (v7x per-TensorCore VMEM)


def _choose_tiles(n_rows, n_lanes, itemsize, target_block_bytes):
    """Pick (tile_r, tile_l, grid_r, grid_l) for an (n_rows, n_lanes) array."""
    sub = {1: 32, 2: 16}.get(itemsize, 8)     # sublane quantum for this dtype

    # Lane tile: lane-dense (multiple of 128 or the full dim), capped so the
    # sublane-padded (1, tile_l) param buffers stay tiny and a minimum-height
    # block still fits the byte budget.
    budget_cap = max(128, (target_block_bytes // (sub * itemsize)) // 128 * 128)
    lane_cap = min(16384, budget_cap)
    if n_lanes <= lane_cap:
        tile_l = n_lanes                      # full lane dim: always legal
    else:
        tile_l = lane_cap                     # multiple of 128, tail masked

    # Row tile: fill the remaining budget, respecting the sublane quantum.
    rows_fit = max(1, target_block_bytes // (tile_l * itemsize))
    if n_rows <= sub:
        tile_r = n_rows                       # full dim: always legal
    else:
        tile_r = max(sub, (min(rows_fit, n_rows) // sub) * sub)

    grid_r = pl.cdiv(n_rows, tile_r)
    grid_l = pl.cdiv(n_lanes, tile_l)

    # Guarantee >= 2 grid steps so the parallel axes can actually shard work
    # across both TensorCores on v7x (only triggers when the whole tensor fits
    # in a single block; rows cannot be split below the sublane quantum).
    if grid_r * grid_l == 1 and n_lanes >= 256:
        tile_l = max(128, (pl.cdiv(n_lanes, 2) + 127) // 128 * 128)
        grid_l = pl.cdiv(n_lanes, tile_l)

    return tile_r, tile_l, grid_r, grid_l


def frozen_batch_norm(x_nchw, weight, bias, running_mean, running_var, eps=1e-5):
    """x_nchw: (N, C, H, W).  Per-channel params: (C,).  Returns (N, C, H, W)."""
    N, C, H, W = x_nchw.shape
    dtype = x_nchw.dtype
    CHW = C * H * W

    # Free, contiguity-preserving reshape (no transpose, no extra HBM pass).
    x_rows = x_nchw.reshape(N, CHW)

    # Precompute per-channel affine once in the wrapper (f32) and expand to a
    # per-lane row vector (one entry per (c, h, w) position).
    w = weight.astype(jnp.float32)
    b = bias.astype(jnp.float32)
    m = running_mean.astype(jnp.float32)
    v = running_var.astype(jnp.float32)
    scale_c = w * jax.lax.rsqrt(v + jnp.float32(eps))           # (C,)
    shift_c = b - m * scale_c                                    # (C,)
    scale_row = jnp.repeat(scale_c, H * W).reshape(1, CHW)       # (1, C*H*W) f32
    shift_row = jnp.repeat(shift_c, H * W).reshape(1, CHW)       # (1, C*H*W) f32

    # VMEM budget: 2x(in + out) double-buffered x-blocks + 4 small padded param
    # buffers must sit well under the per-core limit.
    vmem_limit = min(int(_vmem_capacity_bytes() * 3 // 4), 96 << 20)
    target_block_bytes = max(1 << 20, vmem_limit // 8)

    itemsize = jnp.dtype(dtype).itemsize
    tile_r, tile_l, grid_r, grid_l = _choose_tiles(N, CHW, itemsize,
                                                   target_block_bytes)

    # Lane axis OUTER, row axis INNER: the (1, tile_l) param blocks keep the same
    # block index across all inner steps, so they are only DMA'd when the lane
    # block changes (not every grid step).
    x_spec = pl.BlockSpec((tile_r, tile_l), lambda j, i: (i, j))
    p_spec = pl.BlockSpec((1, tile_l), lambda j, i: (0, j))

    out_rows = pl.pallas_call(
        _frozen_bn_kernel,
        out_shape=jax.ShapeDtypeStruct((N, CHW), dtype),
        grid_spec=pltpu.PrefetchScalarGridSpec(
            num_scalar_prefetch=0,
            grid=(grid_l, grid_r),
            in_specs=[x_spec, p_spec, p_spec],
            out_specs=x_spec,
        ),
        compiler_params=pltpu.CompilerParams(
            dimension_semantics=("parallel", "parallel"),
            vmem_limit_bytes=vmem_limit,
        ),
    )(x_rows, scale_row, shift_row)

    # Free reshape back to NCHW.
    return out_rows.reshape(N, C, H, W)


if __name__ == "__main__":
    key = jax.random.PRNGKey(0)
    N, C, H, W = 2, 4, 16, 16
    eps = 1e-5

    kx, kw, kb, km, kv = jax.random.split(key, 5)
    x = jax.random.normal(kx, (N, C, H, W), dtype=jnp.float32)

    # Deterministic "frozen" parameters (module defaults are identity; use
    # non-trivial values to exercise the math).
    weight = 1.0 + 0.1 * jax.random.normal(kw, (C,), dtype=jnp.float32)
    bias = 0.1 * jax.random.normal(kb, (C,), dtype=jnp.float32)
    running_mean = 0.5 * jax.random.normal(km, (C,), dtype=jnp.float32)
    running_var = jnp.abs(1.0 + 0.1 * jax.random.normal(kv, (C,), dtype=jnp.float32)) - eps

    y = frozen_batch_norm(x, weight, bias, running_mean, running_var, eps=eps)
    y = jax.block_until_ready(y)

    # Pure-JAX reference (mirrors F.batch_norm(..., training=False)).
    scale = weight * jax.lax.rsqrt(running_var + eps)
    shift = bias - running_mean * scale
    y_ref = x * scale.reshape(1, C, 1, 1) + shift.reshape(1, C, 1, 1)

    assert y.shape == x.shape and y.dtype == x.dtype
    assert jnp.allclose(y, y_ref, atol=1e-5, rtol=1e-5), "mismatch vs reference"
    print("KERNEL_OK")
</pallas_src>

<mosaic_0001>
module attributes {stable_mosaic.version = 11 : i64} {
  func.func @_frozen_bn_kernel(%arg0: i32, %arg1: i32, %arg2: memref<2x512xf32, #tpu.memory_space<vmem>>, %arg3: memref<1x512xf32, #tpu.memory_space<vmem>>, %arg4: memref<1x512xf32, #tpu.memory_space<vmem>>, %arg5: memref<2x512xf32, #tpu.memory_space<vmem>>) attributes {dimension_semantics = [#tpu.dimension_semantics<parallel>, #tpu.dimension_semantics<parallel>], iteration_bounds = array<i64: 2, 1>, scalar_prefetch = 0 : i64, scratch_operands = 0 : i64, tpu.core_type = #tpu.core_type<tc>, window_params = [{transform_indices = @transform_0, window_bounds = array<i64: 2, 512>}, {transform_indices = @transform_1, window_bounds = array<i64: 1, 512>}, {transform_indices = @transform_2, window_bounds = array<i64: 1, 512>}, {transform_indices = @transform_3, window_bounds = array<i64: 2, 512>}]} {
    %c0 = arith.constant 0 : index
    %c0_0 = arith.constant 0 : index
    %0 = vector.load %arg2[%c0, %c0_0] : memref<2x512xf32, #tpu.memory_space<vmem>>, vector<2x512xf32>
    %c0_1 = arith.constant 0 : index
    %c0_2 = arith.constant 0 : index
    %1 = vector.load %arg3[%c0_1, %c0_2] : memref<1x512xf32, #tpu.memory_space<vmem>>, vector<1x512xf32>
    %2 = vector.broadcast %1 : vector<1x512xf32> to vector<2x512xf32>
    %3 = arith.mulf %0, %2 : vector<2x512xf32>
    %c0_3 = arith.constant 0 : index
    %c0_4 = arith.constant 0 : index
    %4 = vector.load %arg4[%c0_3, %c0_4] : memref<1x512xf32, #tpu.memory_space<vmem>>, vector<1x512xf32>
    %5 = vector.broadcast %4 : vector<1x512xf32> to vector<2x512xf32>
    %6 = arith.addf %3, %5 : vector<2x512xf32>
    %c0_5 = arith.constant 0 : index
    %c0_6 = arith.constant 0 : index
    %7 = vector.load %arg5[%c0_5, %c0_6] : memref<2x512xf32, #tpu.memory_space<vmem>>, vector<2x512xf32>
    tpu.vector_store %arg5[%c0_5, %c0_6], %6 {strides = array<i32>} : memref<2x512xf32, #tpu.memory_space<vmem>>, vector<2x512xf32>,
    return
  }
  func.func @transform_0(%arg0: i32, %arg1: i32) -> (i32, i32) {
    %c0_i32 = arith.constant 0 : i32
    return %arg1, %arg0 : i32, i32
  }
  func.func @transform_1(%arg0: i32, %arg1: i32) -> (i32, i32) {
    %c0_i32 = arith.constant 0 : i32
    %c0_i32_0 = arith.constant 0 : i32
    return %c0_i32, %arg0 : i32, i32
  }
  func.func @transform_2(%arg0: i32, %arg1: i32) -> (i32, i32) {
    %c0_i32 = arith.constant 0 : i32
    %c0_i32_0 = arith.constant 0 : i32
    return %c0_i32, %arg0 : i32, i32
  }
  func.func @transform_3(%arg0: i32, %arg1: i32) -> (i32, i32) {
    %c0_i32 = arith.constant 0 : i32
    return %arg1, %arg0 : i32, i32
  }
}

</mosaic_0001>

<bundles_post_ra>
// kernel: tpu_custom_call.1
= control target key start
LH: loop header
LB: loop body
LE: loop exit
PB: predicated region body
PF: predicated region fallthrough
CT: control target
= control target key end

     0   :  { %s920_s0 = inlined_call_operand.hbm [shape: f32[2,1024], index: 0, kind: input, shape index: {}]   ;;  %s921_s1 = inlined_call_operand.hbm [shape: f32[1,1024], index: 1, kind: input, shape index: {}]   ;;  %s922_s2 = inlined_call_operand.hbm [shape: f32[1,1024], index: 2, kind: input, shape index: {}]   ;;  %s923_s3 = inlined_call_operand.hbm [shape: f32[2,1024], index: 3, kind: output, shape index: {}]  }
   0x1   :  { %925 = sst [smem:[#allocation14_spill]] %s921_s1 }
   0x2   :  { %8 = vsyncpa [#allocation3], 0 }
   0x3   :  { %10 = vsyncpa [#allocation3 + $0x1], 0 }
   0x4   :  { %11 = vsyncpa [#allocation6], 0 }
   0x5   :  { %13 = vsyncpa [#allocation6 + $0x1], 0 }
   0x6   :  { %14 = vsyncpa [#allocation4], 0 }
   0x7   :  { %16 = vsyncpa [#allocation4 + $0x1], 0  ;;  %s758_s12 = smov 0   ;;  %s760_s13 = smov 0  }
   0x8   :  { %s762_s14 = smov 0   ;;  %s764_s15 = smov 0  }
   0x9   :  { %s766_s16 = smov 0   ;;  %s768_s17 = smov 0  }
   0xa LB: > { %s789_s18 = sadd.s32 4294967295, %s736_s17   ;;  %s466_s19 = sadd.s32 4294967294, %s736_s17   ;;  %s736_s17 = sphi %s768_s17, %s22_s17   ;;  %s732_s16 = sphi %s766_s16, %s941_s16   ;;  %s728_s15 = sphi %s764_s15, %s940_s15   ;;  %s724_s14 = sphi %s762_s14, %s939_s14   ;;  %s720_s13 = sphi %s760_s13, %s938_s13   ;;  %s716_s12 = sphi %s758_s12, %s937_s12  }
   0xb   : > { %s34_s20 = sadd.s32 1, %s732_s16  ;;  %s43_s21 = sadd.s32 1, %s724_s14 }
   0xc   : > { %p36_p0 = scmp.ge.s32.totalorder %s34_s20, 2  ;;  %p50_p1 = scmp.ne.s32.totalorder %s724_s14, %s720_s13 }
   0xd   : > { %p51_p2 = scmp.eq.s32.totalorder %s736_s17, 0  ;;  %p56_p3 = scmp.ne.s32.totalorder %s720_s13, %s716_s12 }
   0xe   : > { %s943_s20 = smov (%p36_p0, %s34_s20), 0  ;;  %p57_p5 = scmp.eq.s32.totalorder %s789_s18, 0 }
   0xf   : > { %926 = sst [smem:[#allocation12_spill]] %s943_s20  ;;  %p801_p4 = por %p51_p2, %p50_p1 }
  0x10   : > { %s39_s23 = ssub.s32 %s732_s16, %s943_s20  ;;  %p134_p6 = scmp.eq.s32.totalorder %s789_s18, 1 }
  0x11   : > { %p41_p7 = scmp.eq.s32.totalorder %s39_s23, 0  ;;  %p809_p8 = por %p57_p5, %p56_p3 }
  0x12   : > { %p813_p9 = por %p134_p6, %p50_p1  ;;  %p140_p10 = scmp.eq.s32.totalorder %s466_s19, 1 }
  0x13   : > { %s818_s26 = scalar_select %p41_p7, %s724_s14, %s43_s21  }
  0x14   : > { %p820_p11 = por %p140_p10, %p56_p3  ;;  %p468_p12 = scmp.ge.s32.totalorder %s736_s17, 2 }
  0x15   : > { %930 = sst [smem:[#allocation13_spill]] %s818_s26  ;;  %p510_p13 = scmp.lt.s32.totalorder %s736_s17, 2 }
  0x16   : > { %s160_s28 = sand.u32 1, %s724_s14   ;;  %s182_s29 = sand.u32 1, %s736_s17  }
  0x17   : > { %s472_s30 = sshll.u32 %s160_s28, 2  ;;  %p830_p0 = pnand %p510_p13, %p801_p4 }
  0x18   : > { %s473_s5 = sshll.u32 %s732_s16, 2  ;;  %s933_s1 = sld [smem:[#allocation14_spill]] }
  0x19   : > { %s186_s10 = scalar_lea.vmem [#allocation5], %s472_s30  ;;  %s183_s19 = scalar_lea.sflag [#allocation6], %s182_s29 }
  0x1a   : > { %s194_s11 = sshll.u32 %s186_s10, 4  ;;  %s209_s23 = scalar_lea.hbm %s922_s2, %s473_s5  ;;  %s195_s11 = int_to_ptr.vmem [resolvable:$true] %s194_s11 }
  0x1b   : > { %p476_p1 = scmp.ge.s32.totalorder %s736_s17, 1  ;;  %p218_p2 = scmp.lt.s32.totalorder %s736_s17, 3 }
  0x1c   : > { %s469_s6 = sshll.u32 %s160_s28, 3  ;;  %s486_s7 = sshll.u32 %s732_s16, 3 }
  0x1d   : > { %p845_p3 = pnand %p476_p1, %p218_p2  ;;  %s164_s26 = scalar_lea.vmem [#allocation2], %s469_s6 }
  0x1e   : > { %s190_s8 = scalar_lea.hbm %s933_s1, %s473_s5  ;;  %s171_s1 = scalar_lea.hbm %s920_s0, %s486_s7 }
  0x1f   : > { %s192_s9 = sshll.u32 %s190_s8, 4  ;;  %s173_s29 = sshll.u32 %s171_s1, 4  ;;  %s193_s9 = int_to_ptr.hbm [resolvable:$true] %s192_s9  ;;  %s174_s29 = int_to_ptr.hbm [resolvable:$true] %s173_s29 }
  0x20   : > { %502 = dma.hbm_to_vmem [thread:$0]  (!%p830_p0), %s193_s9, 64, %s195_s11, %s183_s19  }
  0x21   : > { %s175_s9 = sshll.u32 %s164_s26, 4  ;;  %s161_s11 = scalar_lea.sflag [#allocation3], %s160_s28  ;;  %s176_s9 = int_to_ptr.vmem [resolvable:$true] %s175_s9 }
  0x22   : > { %499 = dma.hbm_to_vmem [thread:$0]  (!%p830_p0), %s174_s29, 128, %s176_s9, %s161_s11  }
  0x23   : > { %s211_s5 = sshll.u32 %s209_s23, 4  ;;  %s205_s21 = scalar_lea.vmem [#allocation7], %s472_s30  ;;  %s212_s5 = int_to_ptr.hbm [resolvable:$true] %s211_s5 }
  0x24   : > { %s213_s22 = sshll.u32 %s205_s21, 4  ;;  %222 = sbr.rel (%p845_p3) target bundleno = 61 (0x3d), region = 32  ;;  %s214_s22 = int_to_ptr.vmem [resolvable:$true] %s213_s22 }
  0x25   : > { %505 = dma.hbm_to_vmem [thread:$0]  (!%p830_p0), %s212_s5, 64, %s214_s22, %s183_s19  }
  0x26   : > { %s860_s1 = sand.u32 (!%p845_p3), 1, %s720_s13  }
  0x27   : > { %s477_s26 = sshll.u32 (!%p845_p3), %s860_s1, 3  ;;  %s225_s28 = scalar_lea.sflag (!%p845_p3), [#allocation3], %s860_s1 }
  0x28   : > { %s228_s23 = scalar_lea.vmem (!%p845_p3), [#allocation2], %s477_s26 }
  0x29   : > { %703 = dma.done.wait (%p809_p8), %s225_s28, 128  }
  0x2a   : > { %705 = vsyncadd (%p809_p8), %s225_s28, 4294967168  ;;  %s234_s20 = sand.u32 1, %s789_s18   ;;  %s478_s30 = sshll.u32 %s860_s1, 2 }
  0x2b   : > { %s235_s4 = scalar_lea.sflag [#allocation6], %s234_s20  ;;  %s238_s19 = scalar_lea.vmem [#allocation5], %s478_s30 }
  0x2c   : > { %707 = dma.done.wait (%p809_p8), %s235_s4, 128  }
  0x2d   : > { %709 = vsyncadd (%p809_p8), %s235_s4, 4294967168  ;;  %vm296_vm0 = vcmask 1041408   ;;  %v287_v0 = vld [vmem:[%s238_s19] sm:$0xf]  ;;  %vm298_vm1 = vcmask 1045508   ;;  %s248_s6 = scalar_lea.vmem [#allocation7], %s478_s30 }
  0x2e   : > { %v304_v1 = vld [vmem:[%s248_s6] sm:$0xf]  ;;  %s487_s7 = sshll.u32 %s728_s15, 3  ;;  %v289_v2 = vperm.slane %v287_v0, 0  ;;  %v290_v3 = vperm.slane %v287_v0, 1  ;;  %v291_v4 = vperm.slane %v287_v0, 2 }
  0x2f   : > { %v292_v5 = vperm.slane %v287_v0, 3  ;;  %v306_v6 = vperm.slane %v304_v1, 0  ;;  %v307_v7 = vperm.slane %v304_v1, 1  ;;  %v308_v8 = vperm.slane %v304_v1, 2  ;;  %s333_s8 = scalar_lea.hbm %s923_s3, %s487_s7  ;;  %v286_v13 = vld [vmem:[%s228_s23] sm:$0xff]  ;;  %s281_s15 = scalar_lea.vmem [#allocation8], %s477_s26 }
  0x30   : > { %v309_v9 = vperm.slane %v304_v1, 3  ;;  %v293_v10 = vrot.slane %v290_v3, 6  ;;  %v294_v11 = vrot.slane %v291_v4, 4  ;;  %vm300_vm2 = vcmask 1043456   ;;  %s335_s10 = sshll.u32 %s281_s15, 4  ;;  %s337_s29 = sshll.u32 %s333_s8, 4  ;;  %s336_s10 = int_to_ptr.vmem [resolvable:$true] %s335_s10  ;;  %s338_s29 = int_to_ptr.hbm [resolvable:$true] %s337_s29 }
  0x31   : > { %v295_v12 = vrot.slane %v292_v5, 2  ;;  %v310_v14 = vrot.slane %v307_v7, 6  ;;  %v311_v15 = vrot.slane %v308_v8, 4  ;;  %s320_s9 = scalar_lea.sflag [#allocation4], %s860_s1  ;;  %s664_s11 = sshra.s32 %s338_s29, 4  ;;  %s665_s11 = int_to_ptr.hbm [resolvable:$true] %s664_s11 }
  0x32   : > { %v312_v16 = vrot.slane %v309_v9, 2  ;;  %v297_v17 = vsel %vm296_vm0, %v289_v2, %v293_v10  ;;  %s666_s5 = scalar_lea.hbm %s665_s11, 8  ;;  %s670_s26 = scalar_lea.hbm %s923_s3, 16 }
  0x33   : > { %v299_v18 = vsel %vm298_vm1, %v294_v11, %v295_v12  ;;  %v313_v20 = vsel %vm296_vm0, %v306_v6, %v310_v14  ;;  %p667_p4 = scmp.ne.s32.totalorder %s665_s11, %s666_s5  ;;  %p671_p7 = scmp.lt.s32.totalorder %s665_s11, %s923_s3 }
  0x34   : > { %v301_v19 = vsel %vm300_vm2, %v297_v17, %v299_v18  ;;  %v314_v21 = vsel %vm298_vm1, %v311_v15, %v312_v16  ;;  %p672_p8 = scmp.lt.s32.totalorder %s670_s26, %s666_s5 }
  0x35   : > { %v303_v22 = vmul.f32 %v301_v19, %v286_v13  ;;  %v315_v23 = vsel %vm300_vm2, %v313_v20, %v314_v21  ;;  %p668_p5 = pnand %p667_p4, %p813_p9 }
  0x36   : > { %p673_p10 = por %p672_p8, %p671_p7 }
  0x37   : > { %v317_v24 = vadd.f32 %v315_v23, %v303_v22  ;;  %p669_p6 = pneg %p668_p5 }
  0x39   : > { %318 = vst [vmem:[%s281_s15] sm:$0xff] %v317_v24  ;;  %p674_p13 = pnand %p673_p10, %p669_p6 }
  0x3b   : > { %677 = shalt.err (!%p674_p13)
}
  0x3c   : > { %494 = dma.vmem_to_hbm [thread:$0]  (%p813_p9), %s336_s10, 128, %s338_s29, %s320_s9  }
  0x3d PF: > { %s349_s1 = sand.u32 1, %s716_s12   ;;  %p507_p0 = pnand %p468_p12, %p820_p11 }
  0x3e   : > { %s350_s20 = scalar_lea.sflag [#allocation4], %s349_s1 }
  0x3f   : > { %p508_p1 = pneg %p507_p0 }
  0x41   : > { %711 = dma.done.wait (%p508_p1), %s350_s20, 128  }
  0x42   : > { %713 = vsyncadd (%p508_p1), %s350_s20, 4294967168  ;;  %s22_s17 = sadd.s32 1, %s736_s17   ;;  %s935_s30 = sld [smem:[#allocation13_spill]] }
  0x43   : > { %p19_p2 = scmp.ge.s32.totalorder %s22_s17, 4   ;;  %s936_s25 = sld [smem:[#allocation12_spill]] }
  0x44   : > { %s937_s12 = smov %s720_s13  ;;  %s938_s13 = smov %s724_s14 }
  0x45   : > { %s940_s15 = smov %s732_s16  ;;  %21 = sbr.rel (!%p19_p2) target bundleno = 10 (0xa), region = 101 }
  0x48   : > { %s939_s14 = smov %s935_s30 }
  0x49   : > { %s941_s16 = smov %s936_s25 }
  0x4a   :  { %356 = vsyncpa [#allocation3], 1 }
  0x4b   :  { %358 = vsyncpa [#allocation3 + $0x1], 1 }
  0x4c   :  { %359 = vsyncpa [#allocation6], 1 }
  0x4d   :  { %361 = vsyncpa [#allocation6 + $0x1], 1 }
  0x4e   :  { %362 = vsyncpa [#allocation4], 1 }
  0x4f   :  { %364 = vsyncpa [#allocation4 + $0x1], 1 }

</bundles_post_ra>
